<compile_context>
chip_gen: v5e
topology: v5e:2x2
jax: 0.10.0
libtpu: 0.0.40
codegen_flags: <defaults>
</compile_context>

<pallas_src>
import jax
import jax.numpy as jnp
from jax import lax
from jax.experimental import pallas as pl
from jax.experimental.pallas import tpu as pltpu


# ----------------------------- Pallas kernel ---------------------------------
def _dsconv_kernel(v_ref, wq_ref, wm_ref, bias_ref, gamma_ref, beta_ref, gmat_ref,
                   o_ref, gsum_ref, vsum_ref):
    n = pl.program_id(1)
    n_last = pl.num_programs(1) - 1

    rows, TN = v_ref.shape                 # rows = 4*C*K
    K = wq_ref.shape[0] // 2
    C = rows // (4 * K)
    OC, N = o_ref.shape
    n_chunks = N // TN                     # static

    @pl.when(n == 0)
    def _init():
        gsum_ref[...] = jnp.zeros_like(gsum_ref)
        vsum_ref[...] = jnp.zeros_like(vsum_ref)

    # Reconstruct the 4 bilinear corner weights from the 2 shipped planes (f32, compact).
    wq = wq_ref[...]                       # (2K, TN) f32
    wy1 = wq[:K, :]
    wx1 = wq[K:, :]
    wy0 = 1.0 - wy1
    wx0 = 1.0 - wx1
    # Corner order must match the wrapper's value packing: (y0,x0),(y0,x1),(y1,x0),(y1,x1).
    wall = jnp.concatenate([wy0 * wx0, wy0 * wx1, wy1 * wx0, wy1 * wx1], axis=0)   # (4K, TN)
    wfull = jnp.concatenate([wall] * C, axis=0)                                    # (4CK, TN)

    # Bilinear combine (VPU, f32 for v5e safety) then ONE bf16 MXU matmul, contraction 4*C*K.
    v = v_ref[...].astype(jnp.float32)                                             # (4CK, TN)
    xw = (v * wfull).astype(jnp.bfloat16)
    y = jnp.dot(wm_ref[...], xw, preferred_element_type=jnp.float32)               # (OC, TN)
    y = y + bias_ref[...]

    # GroupNorm running sums: fold channels -> groups (tiny MXU matmul) + lane reduce (XLU).
    gy = jnp.dot(gmat_ref[...], y, preferred_element_type=jnp.float32)             # (OC, TN)
    gsum_ref[...] += jnp.sum(gy, axis=1, keepdims=True)                            # (OC, 1)

    # Stash the pre-normalization tile into the resident lane-dense (OC, N) output block.
    col = pl.multiple_of(n * TN, TN)
    o_ref[:, pl.ds(col, TN)] = y

    @pl.when(n == n_last)
    def _finalize():
        cnt = float(N * 4)                    # GroupNorm(OC//4, OC): 4 channels per group
        mean = gsum_ref[...] / cnt            # per-channel value == its group mean  (OC, 1)
        gmat = gmat_ref[...]
        gamma = gamma_ref[...]
        beta = beta_ref[...]

        # Pass 1: exact (centered) group variance, chunked over the resident block.
        @pl.loop(0, n_chunks)
        def _var(i):
            c0 = pl.multiple_of(i * TN, TN)
            d = o_ref[:, pl.ds(c0, TN)] - mean
            gd2 = jnp.dot(gmat, d * d, preferred_element_type=jnp.float32)
            vsum_ref[...] += jnp.sum(gd2, axis=1, keepdims=True)

        inv = lax.rsqrt(vsum_ref[...] / cnt + 1e-5)
        scale = inv * gamma
        shift = beta - mean * scale

        # Pass 2: normalize + affine + ReLU, chunked (bounds vreg live ranges / epilogue length).
        @pl.loop(0, n_chunks)
        def _norm(i):
            c0 = pl.multiple_of(i * TN, TN)
            yc = o_ref[:, pl.ds(c0, TN)]
            o_ref[:, pl.ds(c0, TN)] = jnp.maximum(yc * scale + shift, 0.0)


def _pick_tile_n(N, tile_n):
    """Largest lane-aligned (multiple-of-128) divisor of N that is <= tile_n; else whole N."""
    if N % 128 != 0:
        return N
    best = 128
    for cand in range(128, min(tile_n, N) + 1, 128):
        if N % cand == 0:
            best = cand
    return best


def dsconv_matmul_gn_relu(v_all, w2, wm4, bias, gamma, beta, gmat, *, tile_n=512):
    """v_all: [B, 4*C*K, N] bf16 merged corner values (row order (c, corner, k));
       w2:    [B, 2*K, N] f32 (wy1 rows then wx1 rows);
       wm4:   [OC, 4*C*K] bf16 conv weights expanded over corners."""
    B, R, N = v_all.shape
    OC = wm4.shape[0]
    twoK = w2.shape[1]
    TN = _pick_tile_n(N, tile_n)

    # Generation-aware VMEM limit (v7x has 64 MiB/TC, v5e/v6e 128 MiB).
    try:
        vmem_cap = int(pltpu.get_tpu_info().vmem_capacity_bytes)
    except Exception:
        vmem_cap = 64 * 1024 * 1024
    vmem_limit = min(vmem_cap * 3 // 4, 96 * 1024 * 1024)

    cost = pl.CostEstimate(
        flops=2 * B * OC * R * N + 2 * B * OC * OC * N,
        transcendentals=0,
        bytes_accessed=int(v_all.size * 2 + w2.size * 4 + wm4.size * 2 + B * OC * N * 4),
    )

    return pl.pallas_call(
        _dsconv_kernel,
        out_shape=jax.ShapeDtypeStruct((B, OC, N), jnp.float32),
        grid_spec=pltpu.PrefetchScalarGridSpec(
            num_scalar_prefetch=0,
            grid=(B, N // TN),
            in_specs=[
                pl.BlockSpec((None, R, TN), lambda b, n: (b, 0, n)),     # merged corner values
                pl.BlockSpec((None, twoK, TN), lambda b, n: (b, 0, n)),  # 2 interp weight planes
                pl.BlockSpec((OC, R), lambda b, n: (0, 0)),              # expanded conv weights
                pl.BlockSpec((OC, 1), lambda b, n: (0, 0)),              # bias
                pl.BlockSpec((OC, 1), lambda b, n: (0, 0)),              # gamma
                pl.BlockSpec((OC, 1), lambda b, n: (0, 0)),              # beta
                pl.BlockSpec((OC, OC), lambda b, n: (0, 0)),             # GN group-indicator
            ],
            # Output block resident across the N axis (index_map ignores n).
            out_specs=pl.BlockSpec((None, OC, N), lambda b, n: (b, 0, 0)),
            scratch_shapes=[pltpu.VMEM((OC, 1), jnp.float32),   # running group sums
                            pltpu.VMEM((OC, 1), jnp.float32)],  # centered group sq-sums (finalize)
        ),
        compiler_params=pltpu.CompilerParams(
            dimension_semantics=("parallel", "arbitrary"),
            vmem_limit_bytes=vmem_limit,
        ),
        cost_estimate=cost,
    )(v_all, w2, wm4, bias, gamma, beta, gmat)


# ------------------------------- JAX glue ------------------------------------
def group_norm_nchw(x, num_groups, gamma, beta, eps=1e-5):
    b, c, d1, d2 = x.shape
    xg = x.reshape(b, num_groups, c // num_groups, d1, d2)
    mean = jnp.mean(xg, axis=(2, 3, 4), keepdims=True)
    var = jnp.mean((xg - mean) ** 2, axis=(2, 3, 4), keepdims=True)
    xn = ((xg - mean) / jnp.sqrt(var + eps)).reshape(b, c, d1, d2)
    return xn * gamma[None, :, None, None] + beta[None, :, None, None]


def dsconv_pro_forward(x, params, kernel_size=9, extend_scope=1.0, morph=0, tile_n=512):
    """Returns (pallas_output, pure_jax_reference), both [B, OC, W, H]."""
    B, C, W, H = x.shape
    K = kernel_size
    center = K // 2
    OC = params["dsc_w"].shape[0]
    assert OC % 4 == 0, "GroupNorm(OC//4, OC) requires out_channels divisible by 4"

    # ---- offset branch: offset_conv (3x3, pad 1) + GroupNorm(K, 2K) + tanh ----
    offset = lax.conv_general_dilated(
        x, params["off_w"], window_strides=(1, 1), padding=((1, 1), (1, 1)),
        dimension_numbers=("NCHW", "OIHW", "NCHW"))
    offset = offset + params["off_b"][None, :, None, None]
    offset = group_norm_nchw(offset, K, params["gn_off_w"], params["gn_off_b"])
    offset = jnp.tanh(offset)

    y_off, x_off = offset[:, :K], offset[:, K:]

    def cumulative(off):  # cumulative offsets away from the kernel center, center forced to 0
        parts = [None] * K
        parts[center] = jnp.zeros_like(off[:, 0])
        for i in range(1, center + 1):
            parts[center + i] = parts[center + i - 1] + off[:, center + i]
            parts[center - i] = parts[center - i + 1] + off[:, center - i]
        return jnp.stack(parts, axis=1)                                   # [B, K, W, H]

    y_center = jnp.arange(W, dtype=jnp.float32)[None, None, :, None]
    x_center = jnp.arange(H, dtype=jnp.float32)[None, None, None, :]
    spread = jnp.linspace(-center, center, K, dtype=jnp.float32)[None, :, None, None]

    if morph == 0:
        y_new = jnp.broadcast_to(y_center, (B, K, W, H)) + cumulative(y_off) * extend_scope
        x_new = jnp.broadcast_to(x_center + spread, (B, K, W, H))
        # 'b k w h -> b (w k) h'
        y_map = jnp.transpose(y_new, (0, 2, 1, 3)).reshape(B, W * K, H)
        x_map = jnp.transpose(x_new, (0, 2, 1, 3)).reshape(B, W * K, H)
        wk = params["dsc_w"][:, :, :, 0]                                  # [OC, C, K]
    else:
        y_new = jnp.broadcast_to(y_center + spread, (B, K, W, H))
        x_new = jnp.broadcast_to(x_center, (B, K, W, H)) + cumulative(x_off) * extend_scope
        # 'b k w h -> b w (h k)'
        y_map = jnp.transpose(y_new, (0, 2, 3, 1)).reshape(B, W, H * K)
        x_map = jnp.transpose(x_new, (0, 2, 3, 1)).reshape(B, W, H * K)
        wk = params["dsc_w"][:, :, 0, :]                                  # [OC, C, K]

    # ---- grid_sample (bilinear, padding_mode='zeros', align_corners=True) ----
    y_max, x_max = W - 1, H - 1
    y_c = jnp.clip(y_map, 0.0, float(y_max))
    x_c = jnp.clip(x_map, 0.0, float(x_max))
    y0 = jnp.floor(y_c); x0 = jnp.floor(x_c)
    y1 = y0 + 1.0;       x1 = x0 + 1.0
    wy1 = y_c - y0
    wx1 = x_c - x0

    def corner(yi, xi):
        valid = ((yi >= 0) & (yi <= y_max) & (xi >= 0) & (xi <= x_max)).astype(jnp.float32)
        yic = jnp.clip(yi, 0, y_max).astype(jnp.int32)
        xic = jnp.clip(xi, 0, x_max).astype(jnp.int32)
        vals = jax.vmap(lambda f, yy, xx: f[:, yy, xx])(x, yic, xic)      # [B, C, R, S]
        return vals * valid[:, None, :, :]

    # TODO(synk): fuse this gather into the Pallas kernel (resident x + prefetched indices).
    v00 = corner(y0, x0); v01 = corner(y0, x1)
    v10 = corner(y1, x0); v11 = corner(y1, x1)

    # ---- layout into lane-dense [.., N = W*H] slabs for the Pallas kernel ----
    N = W * H

    def vals_to_ckn(v):  # [B, C, R, S] -> [B, C, K, N]   (n = w*H + h)
        if morph == 0:
            v = v.reshape(B, C, W, K, H).transpose(0, 1, 3, 2, 4)
        else:
            v = v.reshape(B, C, W, H, K).transpose(0, 1, 4, 2, 3)
        return v.reshape(B, C, K, N)

    def wgt_to_kn(w):  # [B, R, S] -> [B, K, N]   (compact: NOT broadcast over C)
        if morph == 0:
            w = w.reshape(B, W, K, H).transpose(0, 2, 1, 3)
        else:
            w = w.reshape(B, W, H, K).transpose(0, 3, 1, 2)
        return w.reshape(B, K, N)

    # Merged bf16 value stream [B, 4*C*K, N], row order (c, corner, k), corner order 00,01,10,11.
    v_all = jnp.stack([vals_to_ckn(v) for v in (v00, v01, v10, v11)], axis=2)   # [B, C, 4, K, N]
    v_all = v_all.reshape(B, C * 4 * K, N).astype(jnp.bfloat16)

    # Compact f32 interpolation weights: only wy1, wx1 are shipped ([B, 2K, N]).
    w2 = jnp.concatenate([wgt_to_kn(wy1), wgt_to_kn(wx1)], axis=1).astype(jnp.float32)

    # Conv weights expanded over the 4 corners (column order (c, corner, k)), bf16 for the MXU.
    wm4 = jnp.broadcast_to(wk[:, :, None, :], (OC, C, 4, K)).reshape(OC, C * 4 * K)
    wm4 = wm4.astype(jnp.bfloat16)

    bias = params["dsc_b"].reshape(OC, 1).astype(jnp.float32)
    gamma = params["gn_w"].reshape(OC, 1).astype(jnp.float32)
    beta = params["gn_b"].reshape(OC, 1).astype(jnp.float32)
    gidx = jnp.arange(OC, dtype=jnp.int32) // 4
    gmat = (gidx[:, None] == gidx[None, :]).astype(jnp.float32)           # hoisted GN indicator

    out_mat = dsconv_matmul_gn_relu(v_all, w2, wm4, bias, gamma, beta, gmat,
                                    tile_n=tile_n)                        # [B, OC, N]
    out = out_mat.reshape(B, OC, W, H)

    # ---- pure-JAX reference (mirrors the PyTorch ops, f32 throughout) ----
    wy0 = 1.0 - wy1
    wx0 = 1.0 - wx1
    w00 = wy0 * wx0; w01 = wy0 * wx1; w10 = wy1 * wx0; w11 = wy1 * wx1    # [B, R, S]
    deformed = (w00[:, None] * v00 + w01[:, None] * v01
                + w10[:, None] * v10 + w11[:, None] * v11)                # [B, C, R, S]
    if morph == 0:
        d5 = deformed.reshape(B, C, W, K, H)
        ref = jnp.einsum('bcwkh,ock->bowh', d5, wk)
    else:
        d5 = deformed.reshape(B, C, W, H, K)
        ref = jnp.einsum('bcwhk,ock->bowh', d5, wk)
    ref = ref + params["dsc_b"][None, :, None, None]
    ref = group_norm_nchw(ref, OC // 4, params["gn_w"], params["gn_b"])
    ref = jnp.maximum(ref, 0.0)

    return out, ref


# --------------------------------- main ---------------------------------------
if __name__ == "__main__":
    B, C, OC, K, W, H = 2, 4, 8, 9, 16, 16   # out_channels must be divisible by 4
    key = jax.random.PRNGKey(0)
    keys = jax.random.split(key, 9)

    x = jax.random.normal(keys[0], (B, C, W, H), jnp.float32)

    base = dict(
        off_w=0.1 * jax.random.normal(keys[1], (2 * K, C, 3, 3), jnp.float32),  # offset_conv
        off_b=0.05 * jax.random.normal(keys[2], (2 * K,), jnp.float32),
        gn_off_w=jnp.ones((2 * K,), jnp.float32),                               # gn_offset
        gn_off_b=jnp.zeros((2 * K,), jnp.float32),
        dsc_b=0.05 * jax.random.normal(keys[4], (OC,), jnp.float32),
        gn_w=1.0 + 0.05 * jax.random.normal(keys[5], (OC,), jnp.float32),       # gn
        gn_b=0.05 * jax.random.normal(keys[6], (OC,), jnp.float32),
    )

    for morph in (0, 1):
        p = dict(base)
        if morph == 0:
            p["dsc_w"] = 0.1 * jax.random.normal(keys[3], (OC, C, K, 1), jnp.float32)  # dsc_conv_x
        else:
            p["dsc_w"] = 0.1 * jax.random.normal(keys[7], (OC, C, 1, K), jnp.float32)  # dsc_conv_y

        # tile_n=128 -> N=256 splits into two N tiles per batch, exercising the cross-tile
        # GroupNorm accumulation and the chunked finalize path.
        out, ref = dsconv_pro_forward(x, p, kernel_size=K, extend_scope=1.0, morph=morph,
                                      tile_n=128)
        out = jax.block_until_ready(out)

        assert out.shape == (B, OC, W, H), out.shape
        max_err = float(jnp.max(jnp.abs(out - ref)))
        # bf16 transport of corner values -> bf16-appropriate tolerance
        assert max_err < 5e-2, f"morph={morph}: Pallas vs JAX reference max_err={max_err}"

    print("KERNEL_OK")
</pallas_src>

<mosaic_0001>
module attributes {stable_mosaic.version = 11 : i64} {
  func.func @_dsconv_kernel(%arg0: i32, %arg1: i32, %arg2: memref<1x144x128xbf16, #tpu.memory_space<vmem>>, %arg3: memref<1x18x128xf32, #tpu.memory_space<vmem>>, %arg4: memref<8x144xbf16, #tpu.memory_space<vmem>>, %arg5: memref<8x1xf32, #tpu.memory_space<vmem>>, %arg6: memref<8x1xf32, #tpu.memory_space<vmem>>, %arg7: memref<8x1xf32, #tpu.memory_space<vmem>>, %arg8: memref<8x8xf32, #tpu.memory_space<vmem>>, %arg9: memref<1x8x256xf32, #tpu.memory_space<vmem>>, %arg10: memref<8x1xf32, #tpu.memory_space<vmem>>, %arg11: memref<8x1xf32, #tpu.memory_space<vmem>>) attributes {dimension_semantics = [#tpu.dimension_semantics<parallel>, #tpu.dimension_semantics<arbitrary>], iteration_bounds = array<i64: 2, 2>, scalar_prefetch = 0 : i64, scratch_operands = 2 : i64, tpu.core_type = #tpu.core_type<tc>, window_params = [{transform_indices = @transform_0, window_bounds = array<i64: 1, 144, 128>}, {transform_indices = @transform_1, window_bounds = array<i64: 1, 18, 128>}, {pipeline_mode = #tpu.pipeline_mode<synchronous>, transform_indices = @transform_2, window_bounds = array<i64: 8, 144>}, {pipeline_mode = #tpu.pipeline_mode<synchronous>, transform_indices = @transform_3, window_bounds = array<i64: 8, 1>}, {pipeline_mode = #tpu.pipeline_mode<synchronous>, transform_indices = @transform_4, window_bounds = array<i64: 8, 1>}, {pipeline_mode = #tpu.pipeline_mode<synchronous>, transform_indices = @transform_5, window_bounds = array<i64: 8, 1>}, {pipeline_mode = #tpu.pipeline_mode<synchronous>, transform_indices = @transform_6, window_bounds = array<i64: 8, 8>}, {transform_indices = @transform_7, window_bounds = array<i64: 1, 8, 256>}]} {
    %c0_i32 = arith.constant 0 : i32
    %0 = arith.cmpi eq, %arg1, %c0_i32 : i32
    %1 = arith.extui %0 : i1 to i32
    %c0_i32_0 = arith.constant 0 : i32
    %2 = arith.cmpi ne, %1, %c0_i32_0 : i32
    scf.if %2 {
      %cst_23 = arith.constant 0.000000e+00 : f32
      %43 = vector.broadcast %cst_23 : f32 to vector<8x1xf32>
      %c0_24 = arith.constant 0 : index
      %c0_25 = arith.constant 0 : index
      %44 = vector.load %arg10[%c0_24, %c0_25] : memref<8x1xf32, #tpu.memory_space<vmem>>, vector<8x1xf32>
      tpu.vector_store %arg10[%c0_24, %c0_25], %43 {strides = array<i32>} : memref<8x1xf32, #tpu.memory_space<vmem>>, vector<8x1xf32>,
      %cst_26 = arith.constant 0.000000e+00 : f32
      %45 = vector.broadcast %cst_26 : f32 to vector<8x1xf32>
      %c0_27 = arith.constant 0 : index
      %c0_28 = arith.constant 0 : index
      %46 = vector.load %arg11[%c0_27, %c0_28] : memref<8x1xf32, #tpu.memory_space<vmem>>, vector<8x1xf32>
      tpu.vector_store %arg11[%c0_27, %c0_28], %45 {strides = array<i32>} : memref<8x1xf32, #tpu.memory_space<vmem>>, vector<8x1xf32>,
    } else {
    }
    %c0 = arith.constant 0 : index
    %c0_1 = arith.constant 0 : index
    %c0_2 = arith.constant 0 : index
    %3 = vector.load %arg3[%c0, %c0_1, %c0_2] : memref<1x18x128xf32, #tpu.memory_space<vmem>>, vector<1x18x128xf32>
    %4 = vector.shape_cast %3 : vector<1x18x128xf32> to vector<18x128xf32>
    %5 = vector.extract_strided_slice %4 {offsets = [0, 0], sizes = [9, 128], strides = [1, 1]} : vector<18x128xf32> to vector<9x128xf32>
    %6 = vector.extract_strided_slice %4 {offsets = [9, 0], sizes = [9, 128], strides = [1, 1]} : vector<18x128xf32> to vector<9x128xf32>
    %cst = arith.constant 1.000000e+00 : f32
    %7 = vector.broadcast %cst : f32 to vector<9x128xf32>
    %8 = arith.subf %7, %5 : vector<9x128xf32>
    %cst_3 = arith.constant 1.000000e+00 : f32
    %9 = vector.broadcast %cst_3 : f32 to vector<9x128xf32>
    %10 = arith.subf %9, %6 : vector<9x128xf32>
    %11 = arith.mulf %8, %10 : vector<9x128xf32>
    %12 = arith.mulf %8, %6 : vector<9x128xf32>
    %13 = arith.mulf %5, %10 : vector<9x128xf32>
    %14 = arith.mulf %5, %6 : vector<9x128xf32>
    %15 = tpu.concatenate %11, %12, %13, %14 in 0 : vector<9x128xf32>, vector<9x128xf32>, vector<9x128xf32>, vector<9x128xf32> -> vector<36x128xf32>
    %16 = tpu.concatenate %15, %15, %15, %15 in 0 : vector<36x128xf32>, vector<36x128xf32>, vector<36x128xf32>, vector<36x128xf32> -> vector<144x128xf32>
    %c0_4 = arith.constant 0 : index
    %c0_5 = arith.constant 0 : index
    %c0_6 = arith.constant 0 : index
    %17 = vector.load %arg2[%c0_4, %c0_5, %c0_6] : memref<1x144x128xbf16, #tpu.memory_space<vmem>>, vector<1x144x128xbf16>
    %18 = vector.shape_cast %17 : vector<1x144x128xbf16> to vector<144x128xbf16>
    %19 = arith.extf %18 : vector<144x128xbf16> to vector<144x128xf32>
    %20 = arith.mulf %19, %16 : vector<144x128xf32>
    %21 = arith.truncf %20 : vector<144x128xf32> to vector<144x128xbf16>
    %c0_7 = arith.constant 0 : index
    %c0_8 = arith.constant 0 : index
    %22 = vector.load %arg4[%c0_7, %c0_8] : memref<8x144xbf16, #tpu.memory_space<vmem>>, vector<8x144xbf16>
    %cst_9 = arith.constant dense<0.000000e+00> : vector<8x128xf32>
    %23 = tpu.matmul %22, %21, %cst_9 {dimension_numbers = #tpu.dot_dimension_numbers<[1], [0], [0], [1], [0, 0, 1, 1], [], []>} : vector<8x144xbf16>, vector<144x128xbf16>, vector<8x128xf32> -> vector<8x128xf32>
    %c0_10 = arith.constant 0 : index
    %c0_11 = arith.constant 0 : index
    %24 = vector.load %arg5[%c0_10, %c0_11] : memref<8x1xf32, #tpu.memory_space<vmem>>, vector<8x1xf32>
    %25 = vector.broadcast %24 : vector<8x1xf32> to vector<8x128xf32>
    %26 = arith.addf %23, %25 : vector<8x128xf32>
    %c0_12 = arith.constant 0 : index
    %c0_13 = arith.constant 0 : index
    %27 = vector.load %arg8[%c0_12, %c0_13] : memref<8x8xf32, #tpu.memory_space<vmem>>, vector<8x8xf32>
    %cst_14 = arith.constant dense<0.000000e+00> : vector<8x128xf32>
    %28 = tpu.matmul %27, %26, %cst_14 {dimension_numbers = #tpu.dot_dimension_numbers<[1], [0], [0], [1], [0, 0, 1, 1], [], []>} : vector<8x8xf32>, vector<8x128xf32>, vector<8x128xf32> -> vector<8x128xf32>
    %c0_15 = arith.constant 0 : index
    %c0_16 = arith.constant 0 : index
    %29 = vector.load %arg10[%c0_15, %c0_16] : memref<8x1xf32, #tpu.memory_space<vmem>>, vector<8x1xf32>
    %cst_17 = arith.constant dense<0.000000e+00> : vector<8xf32>
    %30 = vector.multi_reduction <add>, %28, %cst_17 [1] : vector<8x128xf32> to vector<8xf32>
    %31 = vector.shape_cast %30 : vector<8xf32> to vector<8x1xf32>
    %32 = arith.addf %29, %31 : vector<8x1xf32>
    %c0_18 = arith.constant 0 : index
    %c0_19 = arith.constant 0 : index
    %33 = vector.load %arg10[%c0_18, %c0_19] : memref<8x1xf32, #tpu.memory_space<vmem>>, vector<8x1xf32>
    tpu.vector_store %arg10[%c0_18, %c0_19], %32 {strides = array<i32>} : memref<8x1xf32, #tpu.memory_space<vmem>>, vector<8x1xf32>,
    %c128_i32 = arith.constant 128 : i32
    %34 = arith.muli %arg1, %c128_i32 : i32
    %35 = tpu.assume_multiple %34, 128 : i32
    %c0_20 = arith.constant 0 : index
    %c0_21 = arith.constant 0 : index
    %36 = arith.index_cast %35 : i32 to index
    %37 = vector.load %arg9[%c0_20, %c0_21, %36] : memref<1x8x256xf32, #tpu.memory_space<vmem>>, vector<1x8x128xf32>
    %38 = vector.shape_cast %37 : vector<1x8x128xf32> to vector<8x128xf32>
    %39 = vector.shape_cast %26 : vector<8x128xf32> to vector<1x8x128xf32>
    tpu.vector_store %arg9[%c0_20, %c0_21, %36], %39 {strides = array<i32>} : memref<1x8x256xf32, #tpu.memory_space<vmem>>, vector<1x8x128xf32>,
    %c1_i32 = arith.constant 1 : i32
    %40 = arith.cmpi eq, %arg1, %c1_i32 : i32
    %41 = arith.extui %40 : i1 to i32
    %c0_i32_22 = arith.constant 0 : i32
    %42 = arith.cmpi ne, %41, %c0_i32_22 : i32
    scf.if %42 {
      %c0_23 = arith.constant 0 : index
      %c0_24 = arith.constant 0 : index
      %43 = vector.load %arg10[%c0_23, %c0_24] : memref<8x1xf32, #tpu.memory_space<vmem>>, vector<8x1xf32>
      %cst_25 = arith.constant 1.024000e+03 : f32
      %44 = vector.broadcast %cst_25 : f32 to vector<8x1xf32>
      %45 = arith.divf %43, %44 : vector<8x1xf32>
      %c0_26 = arith.constant 0 : index
      %c0_27 = arith.constant 0 : index
      %46 = vector.load %arg8[%c0_26, %c0_27] : memref<8x8xf32, #tpu.memory_space<vmem>>, vector<8x8xf32>
      %c0_28 = arith.constant 0 : index
      %c0_29 = arith.constant 0 : index
      %47 = vector.load %arg6[%c0_28, %c0_29] : memref<8x1xf32, #tpu.memory_space<vmem>>, vector<8x1xf32>
      %c0_30 = arith.constant 0 : index
      %c0_31 = arith.constant 0 : index
      %48 = vector.load %arg7[%c0_30, %c0_31] : memref<8x1xf32, #tpu.memory_space<vmem>>, vector<8x1xf32>
      %c0_i32_32 = arith.constant 0 : i32
      %c2_i32 = arith.constant 2 : i32
      %49 = arith.addi %c0_i32_32, %c2_i32 : i32
      %c1_i32_33 = arith.constant 1 : i32
      scf.for %arg12 = %c0_i32_32 to %49 step %c1_i32_33  : i32 {
        %c1_i32_43 = arith.constant 1 : i32
        %60 = arith.muli %arg12, %c1_i32_43 : i32
        %c0_i32_44 = arith.constant 0 : i32
        %61 = arith.addi %c0_i32_44, %60 : i32
        %c128_i32_45 = arith.constant 128 : i32
        %62 = arith.muli %61, %c128_i32_45 : i32
        %63 = tpu.assume_multiple %62, 128 : i32
        %c0_46 = arith.constant 0 : index
        %c0_47 = arith.constant 0 : index
        %64 = arith.index_cast %63 : i32 to index
        %65 = vector.load %arg9[%c0_46, %c0_47, %64] : memref<1x8x256xf32, #tpu.memory_space<vmem>>, vector<1x8x128xf32>
        %66 = vector.shape_cast %65 : vector<1x8x128xf32> to vector<8x128xf32>
        %67 = vector.broadcast %45 : vector<8x1xf32> to vector<8x128xf32>
        %68 = arith.subf %66, %67 : vector<8x128xf32>
        %69 = arith.mulf %68, %68 : vector<8x128xf32>
        %cst_48 = arith.constant dense<0.000000e+00> : vector<8x128xf32>
        %70 = tpu.matmul %46, %69, %cst_48 {dimension_numbers = #tpu.dot_dimension_numbers<[1], [0], [0], [1], [0, 0, 1, 1], [], []>} : vector<8x8xf32>, vector<8x128xf32>, vector<8x128xf32> -> vector<8x128xf32>
        %c0_49 = arith.constant 0 : index
        %c0_50 = arith.constant 0 : index
        %71 = vector.load %arg11[%c0_49, %c0_50] : memref<8x1xf32, #tpu.memory_space<vmem>>, vector<8x1xf32>
        %cst_51 = arith.constant dense<0.000000e+00> : vector<8xf32>
        %72 = vector.multi_reduction <add>, %70, %cst_51 [1] : vector<8x128xf32> to vector<8xf32>
        %73 = vector.shape_cast %72 : vector<8xf32> to vector<8x1xf32>
        %74 = arith.addf %71, %73 : vector<8x1xf32>
        %c0_52 = arith.constant 0 : index
        %c0_53 = arith.constant 0 : index
        %75 = vector.load %arg11[%c0_52, %c0_53] : memref<8x1xf32, #tpu.memory_space<vmem>>, vector<8x1xf32>
        tpu.vector_store %arg11[%c0_52, %c0_53], %74 {strides = array<i32>} : memref<8x1xf32, #tpu.memory_space<vmem>>, vector<8x1xf32>,
      }
      %c2_i32_34 = arith.constant 2 : i32
      %c0_35 = arith.constant 0 : index
      %c0_36 = arith.constant 0 : index
      %50 = vector.load %arg11[%c0_35, %c0_36] : memref<8x1xf32, #tpu.memory_space<vmem>>, vector<8x1xf32>
      %cst_37 = arith.constant 1.024000e+03 : f32
      %51 = vector.broadcast %cst_37 : f32 to vector<8x1xf32>
      %52 = arith.divf %50, %51 : vector<8x1xf32>
      %cst_38 = arith.constant 9.99999974E-6 : f32
      %53 = vector.broadcast %cst_38 : f32 to vector<8x1xf32>
      %54 = arith.addf %52, %53 : vector<8x1xf32>
      %55 = math.rsqrt %54 : vector<8x1xf32>
      %56 = arith.mulf %55, %47 : vector<8x1xf32>
      %57 = arith.mulf %45, %56 : vector<8x1xf32>
      %58 = arith.subf %48, %57 : vector<8x1xf32>
      %c0_i32_39 = arith.constant 0 : i32
      %c2_i32_40 = arith.constant 2 : i32
      %59 = arith.addi %c0_i32_39, %c2_i32_40 : i32
      %c1_i32_41 = arith.constant 1 : i32
      scf.for %arg12 = %c0_i32_39 to %59 step %c1_i32_41  : i32 {
        %c1_i32_43 = arith.constant 1 : i32
        %60 = arith.muli %arg12, %c1_i32_43 : i32
        %c0_i32_44 = arith.constant 0 : i32
        %61 = arith.addi %c0_i32_44, %60 : i32
        %c128_i32_45 = arith.constant 128 : i32
        %62 = arith.muli %61, %c128_i32_45 : i32
        %63 = tpu.assume_multiple %62, 128 : i32
        %c0_46 = arith.constant 0 : index
        %c0_47 = arith.constant 0 : index
        %64 = arith.index_cast %63 : i32 to index
        %65 = vector.load %arg9[%c0_46, %c0_47, %64] : memref<1x8x256xf32, #tpu.memory_space<vmem>>, vector<1x8x128xf32>
        %66 = vector.shape_cast %65 : vector<1x8x128xf32> to vector<8x128xf32>
        %67 = vector.broadcast %56 : vector<8x1xf32> to vector<8x128xf32>
        %68 = arith.mulf %66, %67 : vector<8x128xf32>
        %69 = vector.broadcast %58 : vector<8x1xf32> to vector<8x128xf32>
        %70 = arith.addf %68, %69 : vector<8x128xf32>
        %cst_48 = arith.constant 0.000000e+00 : f32
        %71 = vector.broadcast %cst_48 : f32 to vector<8x128xf32>
        %72 = arith.maximumf %70, %71 : vector<8x128xf32>
        %c0_49 = arith.constant 0 : index
        %c0_50 = arith.constant 0 : index
        %73 = arith.index_cast %63 : i32 to index
        %74 = vector.load %arg9[%c0_49, %c0_50, %73] : memref<1x8x256xf32, #tpu.memory_space<vmem>>, vector<1x8x128xf32>
        %75 = vector.shape_cast %74 : vector<1x8x128xf32> to vector<8x128xf32>
        %76 = vector.shape_cast %72 : vector<8x128xf32> to vector<1x8x128xf32>
        tpu.vector_store %arg9[%c0_49, %c0_50, %73], %76 {strides = array<i32>} : memref<1x8x256xf32, #tpu.memory_space<vmem>>, vector<1x8x128xf32>,
      }
      %c2_i32_42 = arith.constant 2 : i32
    } else {
    }
    return
  }
  func.func @transform_0(%arg0: i32, %arg1: i32) -> (i32, i32, i32) {
    %c0_i32 = arith.constant 0 : i32
    %c0_i32_0 = arith.constant 0 : i32
    return %arg0, %c0_i32, %arg1 : i32, i32, i32
  }
  func.func @transform_1(%arg0: i32, %arg1: i32) -> (i32, i32, i32) {
    %c0_i32 = arith.constant 0 : i32
    %c0_i32_0 = arith.constant 0 : i32
    return %arg0, %c0_i32, %arg1 : i32, i32, i32
  }
  func.func @transform_2(%arg0: i32, %arg1: i32) -> (i32, i32) {
    %c0_i32 = arith.constant 0 : i32
    %c0_i32_0 = arith.constant 0 : i32
    %c0_i32_1 = arith.constant 0 : i32
    return %c0_i32, %c0_i32_0 : i32, i32
  }
  func.func @transform_3(%arg0: i32, %arg1: i32) -> (i32, i32) {
    %c0_i32 = arith.constant 0 : i32
    %c0_i32_0 = arith.constant 0 : i32
    %c0_i32_1 = arith.constant 0 : i32
    return %c0_i32, %c0_i32_0 : i32, i32
  }
  func.func @transform_4(%arg0: i32, %arg1: i32) -> (i32, i32) {
    %c0_i32 = arith.constant 0 : i32
    %c0_i32_0 = arith.constant 0 : i32
    %c0_i32_1 = arith.constant 0 : i32
    return %c0_i32, %c0_i32_0 : i32, i32
  }
  func.func @transform_5(%arg0: i32, %arg1: i32) -> (i32, i32) {
    %c0_i32 = arith.constant 0 : i32
    %c0_i32_0 = arith.constant 0 : i32
    %c0_i32_1 = arith.constant 0 : i32
    return %c0_i32, %c0_i32_0 : i32, i32
  }
  func.func @transform_6(%arg0: i32, %arg1: i32) -> (i32, i32) {
    %c0_i32 = arith.constant 0 : i32
    %c0_i32_0 = arith.constant 0 : i32
    %c0_i32_1 = arith.constant 0 : i32
    return %c0_i32, %c0_i32_0 : i32, i32
  }
  func.func @transform_7(%arg0: i32, %arg1: i32) -> (i32, i32, i32) {
    %c0_i32 = arith.constant 0 : i32
    %c0_i32_0 = arith.constant 0 : i32
    %c0_i32_1 = arith.constant 0 : i32
    return %arg0, %c0_i32, %c0_i32_0 : i32, i32, i32
  }
}

</mosaic_0001>

<bundles_post_ra>
// kernel: tpu_custom_call.1
= control target key start
LH: loop header
LB: loop body
LE: loop exit
PB: predicated region body
PF: predicated region fallthrough
CT: control target
= control target key end

     0   :  { %s1523_s0 = inlined_call_operand.hbm [shape: bf16[2,144,256], index: 0, kind: input, shape index: {}]   ;;  %s1524_s1 = inlined_call_operand.vmem [shape: f32[2,18,256], index: 1, kind: input, shape index: {}]   ;;  %s1525_s2 = inlined_call_operand.vmem [shape: bf16[8,144], index: 2, kind: input, shape index: {}]   ;;  %s1526_s3 = inlined_call_operand.vmem [shape: f32[8,1], index: 3, kind: input, shape index: {}]   ;;  %s1527_s4 = inlined_call_operand.vmem [shape: f32[8,1], index: 4, kind: input, shape index: {}]   ;;  %s1528_s5 = inlined_call_operand.vmem [shape: f32[8,1], index: 5, kind: input, shape index: {}]   ;;  %s1529_s6 = inlined_call_operand.vmem [shape: f32[8,8], index: 6, kind: input, shape index: {}]   ;;  %s1530_s7 = inlined_call_operand.hbm [shape: f32[2,8,256], index: 7, kind: output, shape index: {}]  }
   0x1   :  { %1539 = sst [smem:[#allocation20_spill]] %s1530_s7 }
   0x2   :  { %12 = vsyncpa [#allocation5], 0 }
   0x3   :  { %14 = vsyncpa [#allocation5 + $0x1], 0 }
   0x4   :  { %15 = vsyncpa [#allocation6], 0 }
   0x5   :  { %17 = vsyncpa [#allocation6 + $0x1], 0  ;;  %s1268_s24 = smov 0   ;;  %s1270_s25 = smov 0  }
   0x6   :  { %s1272_s26 = smov 0   ;;  %s1274_s27 = smov 0  }
   0x7   :  { %s1276_s28 = smov 0   ;;  %s1278_s29 = smov 0  }
   0x8   :  { %s1280_s30 = smov 0   ;;  %s1282_s8 = smov 0  }
   0x9   :  { %s1284_s9 = smov 0   ;;  %s1286_s10 = smov 0  }
   0xa   :  { %s1288_s11 = smov 0  }
   0xb LB: > { %1540 = sst [smem:[#allocation11_spill]] %s1170_s24  ;;  %s849_s12 = sadd.s32 4294967295, %s1210_s11   ;;  %s1210_s11 = sphi %s1288_s11, %s23_s11   ;;  %s1206_s10 = sphi %s1286_s10, %s1571_s10   ;;  %s1202_s9 = sphi %s1284_s9, %s1570_s9   ;;  %s1198_s8 = sphi %s1282_s8, %s1569_s8   ;;  %s1194_s30 = sphi %s1280_s30, %s1568_s30   ;;  %s1190_s29 = sphi %s1278_s29, %s1567_s29   ;;  %s1186_s28 = sphi %s1276_s28, %s1566_s28   ;;  %s1182_s27 = sphi %s1274_s27, %s1565_s27   ;;  %s1178_s26 = sphi %s1272_s26, %s1559_s26   ;;  %s1174_s25 = sphi %s1270_s25, %s1564_s25   ;;  %s1170_s24 = sphi %s1268_s24, %s1563_s24  }
   0xc   : > { %1541 = sst [smem:[#allocation12_spill]] %s1178_s26  ;;  %s850_s13 = sadd.s32 4294967294, %s1210_s11  }
   0xd   : > { %1542 = sst [smem:[#allocation13_spill]] %s1198_s8  ;;  %s32_s14 = sadd.s32 1, %s1202_s9 }
   0xe   : > { %s35_s15 = sadd.s32 1, %s1206_s10  ;;  %p33_p0 = scmp.ge.s32.totalorder %s32_s14, 2 }
   0xf   : > { %s44_s16 = sadd.s32 1, %s1190_s29  ;;  %p51_p1 = scmp.ne.s32.totalorder %s1190_s29, %s1186_s28 }
  0x10   : > { %p52_p2 = scmp.eq.s32.totalorder %s1210_s11, 0  ;;  %s1573_s14 = smov (%p33_p0, %s32_s14), 0 }
  0x11   : > { %1543 = sst [smem:[#allocation14_spill]] %s1573_s14  ;;  %s1575_s15 = smov (!%p33_p0, %s35_s15), %s1206_s10 }
  0x12   : > { %s40_s17 = ssub.s32 %s1202_s9, %s1573_s14  ;;  %p1334_p3 = por %p52_p2, %p51_p1 }
  0x13   : > { %p37_p4 = scmp.ge.s32.totalorder %s1575_s15, 2  ;;  %p57_p5 = scmp.ne.s32.totalorder %s1186_s28, %s1182_s27 }
  0x14   : > { %p58_p6 = scmp.eq.s32.totalorder %s849_s12, 0  ;;  %s203_s19 = sadd.s32 1, %s1178_s26 }
  0x15   : > { %s1577_s15 = smov (%p37_p4, %s1575_s15), 0  ;;  %p213_p8 = scmp.ne.s32.totalorder %s1178_s26, %s1174_s25 }
  0x16   : > { %1545 = sst [smem:[#allocation15_spill]] %s1577_s15  ;;  %p1342_p7 = por %p58_p6, %p57_p5 }
  0x17   : > { %s39_s21 = ssub.s32 %s1206_s10, %s1577_s15  ;;  %p214_p9 = scmp.eq.s32.totalorder %s849_s12, 3 }
  0x18   : > { %s41_s22 = sor.u32 %s40_s17, %s39_s21  ;;  %p201_p10 = scmp.eq.s32.totalorder %s39_s21, 0 }
  0x19   : > { %p42_p11 = scmp.eq.s32.totalorder %s41_s22, 0  ;;  %p1350_p12 = por %p214_p9, %p213_p8 }
  0x1a   : > { %s1355_s27 = scalar_select %p201_p10, %s1178_s26, %s203_s19  }
  0x1b   : > { %s1547_s23 = scalar_select %p1350_p12, 1, 0 }
  0x1c   : > { %1549 = sst [smem:[#allocation17_spill]] %s1355_s27  ;;  %p219_p13 = scmp.ne.s32.totalorder %s1174_s25, %s1170_s24 }
  0x1d   : > { %1548 = sst [smem:[#allocation16_spill]] %s1547_s23  ;;  %p220_p0 = scmp.eq.s32.totalorder %s850_s13, 3 }
  0x1e   : > { %s1358_s14 = scalar_select %p42_p11, %s1190_s29, %s44_s16  }
  0x1f   : > { %p1362_p1 = por %p220_p0, %p219_p13  ;;  %p852_p2 = scmp.ge.s32.totalorder %s1210_s11, 4 }
  0x20   : > { %1550 = sst [smem:[#allocation18_spill]] %s1358_s14  ;;  %s255_s12 = sand.u32 (!%p852_p2), 1, %s1190_s29  }
  0x21   : > { %s1551_s7 = scalar_select %p1362_p1, 1, 0 }
  0x22   : > { %251 = sbr.rel (%p852_p2) target bundleno = 53 (0x35), region = 36  ;;  %s1220_s24 = smov (!%p852_p2), 128  }
  0x23   : > { %1552 = sst [smem:[#allocation19_spill]] %s1551_s7  ;;  %s919_s17 = smul.u32 (!%p852_p2), 36, %s1206_s10 }
  0x24   : > { %s918_s21 = smul.u32 (!%p852_p2), 72, %s255_s12  ;;  %s256_s7 = scalar_lea.sflag (!%p852_p2), [#allocation5], %s255_s12 }
  0x25   : > { %s263_s19 = sadd.s32 (!%p852_p2), %s1202_s9, %s919_s17  ;;  %s1221_s23 = smov (!%p852_p2), 64  }
  0x26   : > { %s853_s22 = sshll.u32 (!%p852_p2), %s263_s19, 2  ;;  %s259_s14 = scalar_lea.vmem (!%p852_p2), [#allocation4], %s918_s21 }
  0x27   : > { %s265_s13 = scalar_lea.hbm %s1523_s0, %s853_s22  ;;  %s268_s27 = sshll.u32 %s259_s14, 4  ;;  %s269_s27 = int_to_ptr.vmem [resolvable:$true] %s268_s27 }
  0x28   : > { %s266_s26 = sshll.u32 %s265_s13, 4  ;;  %s1222_s8 = smov 4   ;;  %s267_s26 = int_to_ptr.hbm [resolvable:$true] %s266_s26 }
  0x29   : > { %924 = dma.hbm_to_vmem [thread:$0]  (%p1334_p3), %s267_s26, 1152, %s269_s27, %s256_s7, %s1220_s24, %s1221_s23, %s1222_s8  }
  0x2a   : > { %277 = sbr.rel (!%p1334_p3) target bundleno = 53 (0x35), region = 44 }
  0x2b   : > { %s920_s17 = smul.u32 (%p1334_p3), 24, %s255_s12 }
  0x2c   : > { %s921_s19 = smul.u32 (%p1334_p3), 6, %s1206_s10 }
  0x2d   : > { %s281_s13 = scalar_lea.vmem (%p1334_p3), [#allocation7], %s920_s17 }
  0x2e   : > { %s283_s15 = sadd.s32 (%p1334_p3), %s1202_s9, %s921_s19 }
  0x2f   : > { %s854_s22 = sshll.u32 %s283_s15, 3 }
  0x30   : > { %s285_s16 = scalar_lea.vmem %s1524_s1, %s854_s22 }
  0x31   : > { %v318_v0 = vld [vmem:[%s285_s16] sm:$0xff]  ;;  %v320_v1 = vld [vmem:[%s285_s16 + $0x10] sm:$0xff] }
  0x32   : > { %v322_v2 = vld [vmem:[%s285_s16 + $0x20] sm:$0xff]  ;;  %319 = vst [vmem:[%s281_s13] sm:$0xff] %v318_v0 }
  0x33   : > { %321 = vst [vmem:[%s281_s13 + $0x8] sm:$0xff] %v320_v1 }
  0x34   : > { %323 = vst [vmem:[%s281_s13 + $0x10] sm:$0xff] %v322_v2 }
  0x35 PF: > { %p855_p3 = scmp.ge.s32.totalorder %s1210_s11, 1  ;;  %p328_p4 = scmp.lt.s32.totalorder %s1210_s11, 5 }
  0x37   : > { %p329_p5 = pnand %p855_p3, %p328_p4 }
  0x38   : > { %s334_s7 = sand.u32 (!%p329_p5), 1, %s1186_s28  }
  0x39   : > { %332 = sbr.rel (%p329_p5) target bundleno = 1075 (0x433), region = 82  ;;  %s335_s26 = scalar_lea.sflag (!%p329_p5), [#allocation5], %s334_s7 }
  0x3a   : > { %s922_s24 = smul.u32 (!%p329_p5), 72, %s334_s7 }
  0x3c   : > { %s1385_s8 = scalar_lea.vmem (!%p329_p5), [#allocation4], %s922_s24 }
  0x3e   : > { %1161 = dma.done.wait (%p1342_p7), %s335_s26, 1152  }
  0x3f   : > { %1163 = vsyncadd (%p1342_p7), %s335_s26, 4294966144  ;;  %s923_s18 = smul.u32 24, %s334_s7  ;;  %s378_s23 = sand.u32 1, %s1174_s25  }
  0x40   : > { %s856_s27 = sshll.u32 %s378_s23, 4  ;;  %p857_p6 = scmp.ne.s32.totalorder %s1194_s30, 0 }
  0x41   : > { %s347_s12 = scalar_lea.vmem [#allocation7], %s923_s18  ;;  %s1394_s17 = scalar_lea.vmem [#allocation8], %s856_s27 }
  0x42   : > { %385 = sbr.rel (%p857_p6) target bundleno = 74 (0x4a), region = 94 }
  0x47   : > { %vm386_vm0 = vcmask 7168   ;;  %v1223_v3 = vmov 0.0  }
  0x48   : > { %387 = vst.msk [vmem:[#allocation2] sm:$0xff] %vm386_vm0, %v1223_v3 }
  0x49   : > { %388 = vst.msk [vmem:[#allocation3] sm:$0xff] %vm386_vm0, %v1223_v3 }
  0x4a PF: > { %v389_v4 = vld [vmem:[%s347_s12] sm:$0xff]  ;;  %v390_v5 = vld [vmem:[%s347_s12 + $0x8] sm:$0xff]  ;;  %v391_v6 = vld [vmem:[%s347_s12 + $0x10] sm:$0x3]  ;;  %vm397_vm1 = vcmask 1046528   ;;  %vm420_vm2 = vcmask 1040384  }
  0x4b   : > { %v392_v7 = vsub.f32 1.0, %v389_v4  ;;  %v393_v8 = vsub.f32 1.0, %v390_v5  ;;  %v394_v9 = vsub.f32 1.0, %v391_v6  ;;  %v407_v10 = vrot.slane %v390_v5, 1  ;;  %v916_v11 = vld [vmem:[%s1385_s8 + $0x38] sm:$0xff]   ;;  %v915_v27 = vld [vmem:[%s1385_s8 + $0x30] sm:$0xff]  }
  0x4c   : > { %v408_v12 = vrot.slane %v391_v6, 1  ;;  %vm428_vm3 = vcmask 1041408   ;;  %vm449_vm4 = vcmask 1043456   ;;  %v904_v17 = vunpack.c.l.bf16 %v916_v11  ;;  %v914_v39 = vld [vmem:[%s1385_s8 + $0x28] sm:$0xff]   ;;  %v913_v53 = vld [vmem:[%s1385_s8 + $0x20] sm:$0xff]   ;;  %v912_v6 = vld [vmem:[%s1385_s8 + $0x18] sm:$0xff]  }
  0x4d   : > { %v398_v13 = vrot.slane %v393_v8, 1  ;;  %v399_v14 = vrot.slane %v394_v9, 1  ;;  %vm436_vm5 = vcmask 1042432   ;;  %v905_v33 = vunpack.c.h.bf16 %v916_v11  ;;  %v917_v58 = vld [vmem:[%s1385_s8 + $0x40] sm:$0xff]   ;;  %v528_v1 = vld [vmem:[%s1525_s2] sm:$0xff]  ;;  %s860_s21 = sshll.u32 %s1194_s30, 7 }
  0x4e   : > { %v409_v15 = vsel %vm397_vm1, %v407_v10, %v408_v12  ;;  %v413_v16 = vmul.f32 %v408_v12, %v393_v8  ;;  %v417_v18 = vmul.f32 %v408_v12, %v390_v5  ;;  %v900_v37 = vunpack.c.l.bf16 %v915_v27  ;;  %s603_s14 = sshra.s32 %s860_s21, 7  ;;  %p862_p7 = scmp.ne.s32.totalorder %s1194_s30, 1 }
  0x4f   : > { %v400_v19 = vsel %vm397_vm1, %v398_v13, %v399_v14  ;;  %v404_v20 = vmul.f32 %v399_v14, %v393_v8  ;;  %v412_v21 = vmul.f32 %v409_v15, %v392_v7  ;;  %v415_v22 = vmul.f32 %v399_v14, %v390_v5  ;;  %v529_v14 = vld [vmem:[%s1526_s3] sm:$0xff]  ;;  %s861_s16 = sshll.u32 %s603_s14, 3  ;;  %s1212_s30 = smov (!%p862_p7), 0  }
  0x50   : > { %v1400_v23 = vmul.f32 %v400_v19, %v392_v7  ;;  %v414_v24 = vmul.f32 %v400_v19, %v389_v4  ;;  %v422_v25 = vrot.slane %v413_v16, 7  ;;  %v416_v26 = vmul.f32 %v409_v15, %v389_v4  ;;  %s606_s13 = scalar_lea.vmem %s1394_s17, %s861_s16 [#allocation8] }
  0x51   : > { %v421_v28 = vrot.slane %v412_v21, 7  ;;  %v430_v29 = vrot.slane %v415_v22, 6  ;;  %v438_v30 = vrot.slane %v417_v18, 5  ;;  %v901_v38 = vunpack.c.h.bf16 %v915_v27 }
  0x52   : > { %v429_v31 = vrot.slane %v414_v24, 6  ;;  %v450_v32 = vrot.slane %v1400_v23, 4  ;;  %v437_v34 = vrot.slane %v416_v26, 5  ;;  %v896_v48 = vunpack.c.l.bf16 %v914_v39  ;;  %v910_v26 = vld [vmem:[%s1385_s8 + $0x8] sm:$0xff]  }
  0x53   : > { %v423_v35 = vsel %vm420_vm2, %v421_v28, %v422_v25  ;;  %v1406_v36 = vsel %vm420_vm2, %v404_v20, %v421_v28  ;;  %v897_v52 = vunpack.c.h.bf16 %v914_v39  ;;  %v892_v60 = vunpack.c.l.bf16 %v913_v53 }
  0x54   : > { %v1410_v40 = vsel %vm428_vm3, %v423_v35, %v429_v31  ;;  %v451_v41 = vrot.slane %v1406_v36, 4  ;;  %v431_v42 = vsel %vm428_vm3, %v429_v31, %v430_v29  ;;  %v439_v43 = vsel %vm436_vm5, %v437_v34, %v438_v30 }
  0x55   : > { %v453_v44 = vrot.slane %v1410_v40, 4  ;;  %v1417_v45 = vsel %vm436_vm5, %v431_v42, %v437_v34  ;;  %v464_v46 = vsel %vm449_vm4, %v439_v43, %v450_v32  ;;  %v457_v51 = vrot.slane %v439_v43, 4 }
  0x56   : > { %v452_v47 = vsel %vm449_vm4, %v450_v32, %v451_v41  ;;  %v455_v55 = vrot.slane %v1417_v45, 4  ;;  %v513_v56 = vmul.f32 %v900_v37, %v1417_v45  ;;  %v514_v57 = vmul.f32 %v901_v38, %v464_v46  ;;  %v875_v32 = vld [vmem:[%s1385_s8] sm:$0xff]  }
  0x57   : > { %v454_v49 = vsel %vm449_vm4, %v451_v41, %v453_v44  ;;  %v515_v50 = vmul.f32 %v904_v17, %v452_v47  ;;  %v511_v61 = vmul.f32 %v896_v48, %v1406_v36  ;;  %v512_v62 = vmul.f32 %v897_v52, %v1410_v40  ;;  %v911_v17 = vld [vmem:[%s1385_s8 + $0x10] sm:$0xff]  }
  0x58   : > { %v516_v54 = vmul.f32 %v905_v33, %v454_v49  ;;  %v908_v63 = vunpack.c.l.bf16 %v917_v58  ;;  %v909_v0 = vunpack.c.h.bf16 %v917_v58  ;;  %v525_v2 = vpack.c.bf16 %v514_v57, %v513_v56  ;;  %v596_v52 = vld [vmem:[#allocation2] sm:$0xff] }
  0x59   : > { %v458_v3 = vsel %vm449_vm4, %v455_v55, %v457_v51  ;;  %v893_v4 = vunpack.c.h.bf16 %v913_v53  ;;  %v456_v5 = vsel %vm449_vm4, %v453_v44, %v455_v55  ;;  %v537_v9 = vunpack.c.h.b16 %v528_v1 }
  0x5a   : > { %v526_v59 = vpack.c.bf16 %v516_v54, %v515_v50  ;;  %v517_v7 = vmul.f32 %v908_v63, %v456_v5  ;;  %v518_v8 = vmul.f32 %v909_v0, %v458_v3  ;;  %v524_v10 = vpack.c.bf16 %v512_v62, %v511_v61 }
  0x5b   : > { %v509_v11 = vmul.f32 %v892_v60, %v458_v3  ;;  %v888_v12 = vunpack.c.l.bf16 %v912_v6  ;;  %v510_v15 = vmul.f32 %v893_v4, %v1400_v23  ;;  %v889_v16 = vunpack.c.h.bf16 %v912_v6 }
  0x5c   : > { %545 = vmatpush.bf16.msra.mxu0 %v526_v59  ;;  %v527_v13 = vpack.c.bf16 %v518_v8, %v517_v7  ;;  %v539_v18 = vpack.c.b16 %v537_v9, %v537_v9  ;;  %vm541_vm6 = vcmask 130048   ;;  %v1224_v19 = vmov 0  }
  0x5d   : > { %1045 = vset.pattern.permute.xlu0 %v1224_v19  ;;  %v884_v20 = vunpack.c.l.bf16 %v911_v17  ;;  %v523_v21 = vpack.c.bf16 %v510_v15, %v509_v11  ;;  %v507_v22 = vmul.f32 %v888_v12, %v454_v49  ;;  %v508_v24 = vmul.f32 %v889_v16, %v456_v5 }
  0x5e   : > { %565 = vmatpush.bf16.msra.mxu1 %v527_v13  ;;  %532 = vperm.xlu0 %1045, %v529_v14   ;;  %v885_v25 = vunpack.c.h.bf16 %v911_v17  ;;  %v880_v27 = vunpack.c.l.bf16 %v910_v26  ;;  %v881_v31 = vunpack.c.h.bf16 %v910_v26  ;;  %v876_v37 = vunpack.c.l.bf16 %v875_v32 }
  0x5f   : > { %v522_v28 = vpack.c.bf16 %v508_v24, %v507_v22  ;;  %v505_v29 = vmul.f32 %v884_v20, %v464_v46  ;;  %v877_v38 = vunpack.c.h.bf16 %v875_v32  ;;  %v536_v43 = vunpack.c.l.b16 %v528_v1 }
  0x60   : > { %546 = vmatpush.bf16.msra.mxu0 %v525_v2  ;;  %v506_v30 = vmul.f32 %v885_v25, %v452_v47  ;;  %v503_v33 = vmul.f32 %v880_v27, %v1410_v40  ;;  %v504_v35 = vmul.f32 %v881_v31, %v1417_v45  ;;  %v501_v41 = vmul.f32 %v876_v37, %v1400_v23  ;;  %v571_v23 = vld [vmem:[%s1529_s6] sm:$0xff] }
  0x61   : > { %858 = vmatmul.msk.bf16.vlgmr.msra.gmra.mxu1 %vm541_vm6, %v539_v18  ;;  %v502_v42 = vmul.f32 %v877_v38, %v1406_v36  ;;  %v538_v46 = vpack.c.b16 %v536_v43, %v536_v43  ;;  %vm572_vm7 = vcmask 64512   ;;  %vm600_vm8 = vcmask 7168  }
  0x62   : > { %v521_v34 = vpack.c.bf16 %v506_v30, %v505_v29  ;;  %v520_v39 = vpack.c.bf16 %v504_v35, %v503_v33 }
  0x63   : > { %v519_v44 = vpack.c.bf16 %v502_v42, %v501_v41 }
  0x64   : > { %547 = vmatpush.bf16.msra.mxu0 %v524_v10 }
  0x68   : > { %548 = vmatpush.bf16.msra.mxu0 %v523_v21 }
  0x6c   : > { %549 = vmatpush.bf16.msra.mxu0 %v522_v28 }
  0x70   : > { %550 = vmatpush.bf16.msra.mxu0 %v521_v34 }
  0x74   : > { %551 = vmatpush.bf16.msra.mxu0 %v520_v39 }
  0x78   : > { %552 = vmatpush.bf16.msra.mxu0 %v519_v44 }
  0x7b   : > { %553 = vmatmul.bf16.vlgmr.msra.gmra.mxu0 %v538_v46 }
  0xd0   : > { %v533_v45 = vpop.permute.xlu0 %532 }
  0xde   : > { %v567_v40 = vpop.f32.mrf.mxu1 }
  0xe6   : > { %v569_v47 = vpop.f32.mrf.mxu1 }
  0xf8   : > { %v554_v48 = vpop.f32.mrf.mxu0 }
  0xf9   : > { %v555_v49 = vadd.f32 %v554_v48, %v533_v45 }
  0xfb   : > { %v568_v50 = vadd.f32 %v567_v40, %v555_v49 }
  0xfd   : > { %591 = vmatpush.msra.mxu2 %v568_v50  ;;  %607 = vst [vmem:[%s606_s13] sm:$0xff] %v568_v50 }
  0xfe   : > { %859 = vmatmul.msk.f32.vlgmr.msra.gmra.mxu2 %vm572_vm7, %v571_v23 }
 0x100   : > { %v556_v36 = vpop.f32.mrf.mxu0 }
 0x181   : > { %v593_v51 = vpop.f32.mrf.mxu2 }
 0x182   : > { %597 = vadd.xlane.f32.xlu0 %v593_v51 }
 0x1f4   : > { %611 = sbr.rel (%p862_p7) target bundleno = 1054 (0x41e), region = 98 }
 0x1f5   : > { %v598_v53 = vpop.xlane.xlu0 %597 }
 0x1f6   : > { %v599_v54 = vadd.f32 %v598_v53, %v596_v52 }
 0x1f8   : > { %601 = vst.msk [vmem:[#allocation2] sm:$0xff] %vm600_vm8, %v599_v54 }
 0x1f9   : > { %v621_v55 = vld [vmem:[%s1529_s6] sm:$0xff]  ;;  %v1225_v57 = vmov 1024.0  }
 0x1fa   : > { %v622_v56 = vld [vmem:[%s1527_s4] sm:$0xff]  ;;  %1046 = vrcp.f32 %v1225_v57 }
 0x1fb   : > { %v1462_v58 = vld [vmem:[%s1528_s5] sm:$0xff] }
 0x1ff   : > { %v612_v63 = vld [vmem:[#allocation2] sm:$0xff] }
 0x200   : > { %v1047_v59 = vpop.eup %1046 }
 0x201   : > { %v614_v60 = vmul.f32 1024.0, %v1047_v59  ;;  %vm618_vm9 = vweird.f32 %v1047_v59 }
 0x203   : > { %v615_v61 = vsub.f32 1.0, %v614_v60 }
 0x205   : > { %v616_v62 = vmul.f32 %v1047_v59, %v615_v61 }
 0x207   : > { %v617_v0 = vadd.f32 %v1047_v59, %v616_v62 }
 0x209   : > { %v619_v1 = vsel %vm618_vm9, %v1047_v59, %v617_v0 }
 0x20a   : > { %v620_v2 = vmul.f32 %v619_v1, %v612_v63 }
 0x20b LB: >> { %v1226_v3 = vmov 0   ;;  %s863_s19 = sshll.u32 %s1214_s30, 7  ;;  %v666_v9 = vld [vmem:[#allocation3] sm:$0xff]  ;;  %s629_s30 = sadd.s32 1, %s1214_s30   ;;  %s1214_s30 = sphi %s1212_s30, %s629_s30  }
 0x20c   : >> { %1048 = vset.pattern.permute.xlu0 %v1226_v3  ;;  %s631_s15 = sshra.s32 %s863_s19, 7  ;;  %p626_p8 = scmp.ge.s32.totalorder %s629_s30, 2  }
 0x20d   : >> { %638 = vperm.xlu0 %1048, %v620_v2   ;;  %s864_s22 = sshll.u32 %s631_s15, 3  ;;  %s1216_s14 = smov (%p626_p8), 0  }
 0x20e   : >> { %s634_s21 = scalar_lea.vmem %s1394_s17, %s864_s22 [#allocation8] }
 0x20f   : >> { %v635_v4 = vld [vmem:[%s634_s21] sm:$0xff] }
 0x27f   : >> { %v639_v5 = vpop.permute.xlu0 %638 }
 0x280   : >> { %v641_v6 = vsub.f32 %v635_v4, %v639_v5 }
 0x282   : >> { %v642_v7 = vmul.f32 %v641_v6, %v641_v6 }
 0x284   : >> { %661 = vmatpush.msra.mxu0 %v642_v7 }
 0x285   : >> { %865 = vmatmul.msk.f32.vlgmr.msra.gmra.mxu0 %vm572_vm7, %v621_v55 }
 0x302   : >> { %v663_v8 = vpop.f32.mrf.mxu0 }
 0x303   : >> { %667 = vadd.xlane.f32.xlu0 %v663_v8 }
 0x375   : > { %628 = sbr.rel (!%p626_p8) target bundleno = 523 (0x20b), region = 164 }
 0x376   : >> { %v668_v10 = vpop.xlane.xlu0 %667 }
 0x377   : >> { %v669_v11 = vadd.f32 %v668_v10, %v666_v9 }
 0x379   : >> { %670 = vst.msk [vmem:[#allocation3] sm:$0xff] %vm600_vm8, %v669_v11 }
 0x380   : > { %v671_v12 = vld [vmem:[#allocation3] sm:$0xff] }
 0x381   : > { %v672_v13 = vmul.f32 %v671_v12, %v619_v1 }
 0x383   : > { %v673_v14 = vadd.f32 1e-05, %v672_v13 }
 0x385   : > { %1049 = vrsqrt.f32 %v673_v14  ;;  %vm680_vm10 = vweird.f32 %v673_v14 }
 0x38b   : > { %v1050_v15 = vpop.eup %1049 }
 0x38c   : > { %v675_v16 = vmul.f32 %v1050_v15, %v673_v14  ;;  %vm681_vm11 = vweird.f32 %v1050_v15 }
 0x38d   : > { %vm682_vm12 = vmor %vm680_vm10, %vm681_vm11 }
 0x38e   : > { %v676_v17 = vmul.f32 %v1050_v15, %v675_v16 }
 0x390   : > { %v677_v18 = vmul.f32 0.5, %v676_v17 }
 0x392   : > { %v678_v19 = vsub.f32 1.5, %v677_v18 }
 0x394   : > { %v679_v20 = vmul.f32 %v1050_v15, %v678_v19 }
 0x396   : > { %v683_v21 = vsel %vm682_vm12, %v1050_v15, %v679_v20 }
 0x397   : > { %v684_v22 = vmul.f32 %v683_v21, %v622_v56 }
 0x399   : > { %v685_v24 = vmul.f32 %v684_v22, %v620_v2 }
 0x39b   : > { %v686_v25 = vsub.f32 %v1462_v58, %v685_v24 }
 0x39c LB: >> { %v1227_v26 = vmov 0   ;;  %s866_s16 = sshll.u32 %s1218_s14, 7  ;;  %s692_s14 = sadd.s32 1, %s1218_s14   ;;  %s1218_s14 = sphi %s1216_s14, %s692_s14  }
 0x39d   : >> { %1051 = vset.pattern.permute.xlu0 %v1227_v26  ;;  %s694_s13 = sshra.s32 %s866_s16, 7  ;;  %p689_p9 = scmp.ge.s32.totalorder %s692_s14, 2  }
 0x39e   : >> { %701 = vperm.xlu0 %1051, %v684_v22   ;;  %s867_s7 = sshll.u32 %s694_s13, 3 }
 0x39f   : >> { %s697_s24 = scalar_lea.vmem %s1394_s17, %s867_s7 [#allocation8] }
 0x3a0   : >> { %v698_v28 = vld [vmem:[%s697_s24] sm:$0xff] }
 0x3a6   : >> { %707 = vperm.xlu0 %1051, %v686_v25  }
 0x410   : >> { %v702_v27 = vpop.permute.xlu0 %701 }
 0x411   : >> { %v704_v29 = vmul.f32 %v702_v27, %v698_v28 }
 0x418   : >> { %v708_v30 = vpop.permute.xlu0 %707 }
 0x419   : >> { %v710_v31 = vadd.f32 %v708_v30, %v704_v29  ;;  %691 = sbr.rel (!%p689_p9) target bundleno = 924 (0x39c), region = 175 }
 0x41b   : >> { %v711_v32 = vmax.f32 %v710_v31, 0.0 }
 0x41d   : >> { %712 = vst [vmem:[%s697_s24] sm:$0xff] %v711_v32 }
 0x41e PF: > { %s1553_s26 = sld [smem:[#allocation13_spill]]  ;;  %s727_s19 = sshll.u32 %s1394_s17, 4  ;;  %s728_s19 = int_to_ptr.vmem [resolvable:$true] %s727_s19 }
 0x41f   : > { %s1555_s20 = sld [smem:[#allocation20_spill]]  ;;  %s714_s22 = scalar_lea.sflag [#allocation6], %s378_s23 }
 0x424   : > { %s873_s18 = sshll.u32 %s1553_s26, 4 }
 0x425   : > { %s725_s30 = scalar_lea.hbm %s1555_s20, %s873_s18  ;;  %s1100_s7 = scalar_lea.hbm %s1555_s20, 32 }
 0x426   : > { %s729_s15 = sshll.u32 %s725_s30, 4  ;;  %s730_s15 = int_to_ptr.hbm [resolvable:$true] %s729_s15 }
 0x427   : > { %s1094_s21 = sshra.s32 %s730_s15, 4  ;;  %s1095_s21 = int_to_ptr.hbm [resolvable:$true] %s1094_s21 }
 0x428   : > { %s1096_s14 = scalar_lea.hbm %s1095_s21, 16  ;;  %p1101_p0 = scmp.lt.s32.totalorder %s1095_s21, %s1555_s20 }
 0x429   : > { %p1097_p10 = scmp.ne.s32.totalorder %s1095_s21, %s1096_s14  ;;  %p1102_p2 = scmp.lt.s32.totalorder %s1100_s7, %s1096_s14 }
 0x42b   : > { %p1098_p11 = pnand %p1097_p10, %p1350_p12  ;;  %p1103_p3 = por %p1102_p2, %p1101_p0 }
 0x42d   : > { %p1099_p13 = pneg %p1098_p11 }
 0x42f   : > { %p1104_p4 = pnand %p1103_p3, %p1099_p13 }
 0x431   : > { %1107 = shalt.err (!%p1104_p4)
}
 0x432   : > { %926 = dma.vmem_to_hbm [thread:$0]  (%p1350_p12), %s728_s19, 256, %s730_s15, %s714_s22  }
 0x433 PF: > { %s1556_s23 = sld [smem:[#allocation11_spill]]  ;;  %p932_p5 = scmp.ge.s32.totalorder %s1210_s11, 2 }
 0x435   : > { %p929_p6 = pnand %p932_p5, %p1362_p1 }
 0x437   : > { %p930_p7 = pneg %p929_p6 }
 0x439   : > { %s741_s18 = sand.u32 1, %s1556_s23  }
 0x43a   : > { %s742_s27 = scalar_lea.sflag [#allocation6], %s741_s18 }
 0x43b   : > { %1165 = dma.done.wait (%p930_p7), %s742_s27, 256  }
 0x43c   : > { %1167 = vsyncadd (%p930_p7), %s742_s27, 4294967040  ;;  %s23_s11 = sadd.s32 1, %s1210_s11   ;;  %s1558_s12 = sld [smem:[#allocation12_spill]] }
 0x43d   : > { %p20_p8 = scmp.ge.s32.totalorder %s23_s11, 6   ;;  %s1559_s26 = sld [smem:[#allocation17_spill]] }
 0x43e   : > { %s1560_s8 = sld [smem:[#allocation18_spill]]  ;;  %s1563_s24 = smov %s1174_s25 }
 0x43f   : > { %s1561_s19 = sld [smem:[#allocation14_spill]]  ;;  %s1565_s27 = smov %s1186_s28 }
 0x440   : > { %s1562_s15 = sld [smem:[#allocation15_spill]]  ;;  %s1566_s28 = smov %s1190_s29 }
 0x441   : > { %s1568_s30 = smov %s1202_s9 }
 0x442   : > { %s1564_s25 = smov %s1558_s12  ;;  %22 = sbr.rel (!%p20_p8) target bundleno = 11 (0xb), region = 186 }
 0x444   : > { %s1567_s29 = smov %s1560_s8  ;;  %s1569_s8 = smov %s1206_s10 }
 0x445   : > { %s1570_s9 = smov %s1561_s19 }
 0x446   : > { %s1571_s10 = smov %s1562_s15 }
 0x447   :  { %748 = vsyncpa [#allocation5], 1 }
 0x448   :  { %750 = vsyncpa [#allocation5 + $0x1], 1 }
 0x449   :  { %751 = vsyncpa [#allocation6], 1 }
 0x44a   :  { %753 = vsyncpa [#allocation6 + $0x1], 1 }

</bundles_post_ra>
